<compile_context>
chip_gen: v5e
topology: v5e:2x2
jax: 0.10.0
libtpu: 0.0.40
codegen_flags: <defaults>
</compile_context>

<pallas_src>
import functools

import jax
import jax.numpy as jnp
from jax.experimental import pallas as pl
from jax.experimental.pallas import tpu as pltpu


def _sgc_kernel(x_ref, w_ref, b_ref, o_ref):
    # x arrives as raw f32 rows; cast to bf16 in-kernel so the MXU runs a
    # bf16 matmul with f32 accumulation (cast is hidden under the DMA).
    x = x_ref[...].astype(jnp.bfloat16)
    logits = jnp.dot(x, w_ref[...], preferred_element_type=jnp.float32)
    # Bias add in f32; padded output lanes carry -1e30 so exp() underflows to
    # exactly 0 and they receive zero probability.
    logits = logits + b_ref[...]              # (1, Cout_p) broadcasts over rows

    # Numerically-stable softmax along the last (lane) axis == torch dim=1.
    m = jnp.max(logits, axis=-1, keepdims=True)
    e = jnp.exp(logits - m)
    denom = jnp.sum(e, axis=-1, keepdims=True)
    # Exact division: kernel is HBM-bound, the divide is free, and rows sum
    # to 1 to full precision (no approx-reciprocal error).
    o_ref[...] = (e / denom).astype(o_ref.dtype)


def _round_up(v, m):
    return ((v + m - 1) // m) * m


@functools.partial(jax.jit,
                   static_argnames=("block_rows", "out_dtype", "unpad"))
def sgc_forward(x, w, b, *, block_rows=1024, out_dtype=jnp.bfloat16,
                unpad=True):
    """x: (N, Cin) f32, w: (Cin, Cout) f32, b: (Cout,) f32 -> (N, Cout)."""
    N, Cin = x.shape
    Cout = w.shape[1]

    # Only the OUTPUT feature dim is padded to a lane-dense 128 multiple;
    # x and the contraction dim stay at raw width (no extra pass over x).
    Cout_p = _round_up(max(Cout, 128), 128)

    # Row tiling: target >= 2 grid steps (v7x megacore uses both TCs) while
    # balancing the last tile and capping rows/step at `block_rows`.
    # Per-step VMEM ~ 2*TM*Cin*4 (x dbl-buf) + 2*TM*Cout_p*2 (out dbl-buf)
    #              + Cin*Cout_p*2 (resident W) + f32 temporaries -> a few MiB
    # at TM=1024 for typical SGC widths, under every generation's default.
    num_steps = max(pl.cdiv(N, block_rows), 2 if N >= 16 else 1)
    TM = _round_up(pl.cdiv(N, num_steps), 8)
    N_p = _round_up(N, TM)
    grid = (N_p // TM,)

    # x: no feature-dim padding / dtype cast in the wrapper (that would be an
    # extra full pass over the dominant HBM stream). Only pad ragged rows.
    xp = x if N_p == N else jnp.pad(x, ((0, N_p - N), (0, 0)))

    # Weight / bias prep is tiny (one pass over W; done once per call).
    wp = jnp.zeros((Cin, Cout_p), jnp.bfloat16).at[:, :Cout].set(
        w.astype(jnp.bfloat16))
    bp = jnp.full((1, Cout_p), -1e30, dtype=jnp.float32).at[0, :Cout].set(
        b.astype(jnp.float32))

    out_bytes = jnp.dtype(out_dtype).itemsize
    cost = pl.CostEstimate(
        flops=2 * N_p * Cin * Cout_p,
        transcendentals=N_p * Cout_p,                    # one exp per lane
        bytes_accessed=(N_p * Cin * 4                    # x (f32 read)
                        + Cin * Cout_p * 2 + Cout_p * 4  # W + b (read)
                        + N_p * Cout_p * out_bytes))     # out (write)

    out_p = pl.pallas_call(
        _sgc_kernel,
        out_shape=jax.ShapeDtypeStruct((N_p, Cout_p), out_dtype),
        grid=grid,
        in_specs=[
            # x: one raw-f32 row tile per step (pipelined, double-buffered).
            pl.BlockSpec((TM, Cin), lambda i: (i, 0)),
            # W, b: same block every step -> fetched once, stay VMEM-resident.
            # TODO(synk): for very wide layers on v7x (64 MiB VMEM), add
            # pipeline_mode=pl.Buffered(1) here and a K-tiling grid axis with
            # an f32 accumulator + pl.when init/finalize.
            pl.BlockSpec((Cin, Cout_p), lambda i: (0, 0)),
            pl.BlockSpec((1, Cout_p), lambda i: (0, 0)),
        ],
        out_specs=pl.BlockSpec((TM, Cout_p), lambda i: (i, 0)),
        compiler_params=pltpu.CompilerParams(
            # Row tiles are independent -> shard across TCs on v7x megacore.
            dimension_semantics=("parallel",),
        ),
        cost_estimate=cost,
    )(xp, wp, bp)

    if not unpad:
        # Perf path: padded lanes hold exactly-zero probabilities and padded
        # rows are harmless softmax(b); let the consumer fuse/ignore them.
        return out_p
    # Convenience path matching the PyTorch module's (N, Cout) output.
    return out_p[:N, :Cout]


if __name__ == "__main__":
    # Deterministic synthetic parameters / inputs (no checkpoint loading).
    in_channels, out_channels = 32, 16
    batch = 8

    key = jax.random.PRNGKey(0)
    kx, kw, kb = jax.random.split(key, 3)

    x = jax.random.normal(kx, (batch, in_channels), dtype=jnp.float32)
    # nn.Linear(in, out): weight (out, in), bias (out,). Store transposed for x @ W.
    w = (jax.random.normal(kw, (out_channels, in_channels), dtype=jnp.float32)
         * (1.0 / jnp.sqrt(in_channels))).T  # -> (in, out)
    b = jax.random.normal(kb, (out_channels,), dtype=jnp.float32) * 0.01

    out = sgc_forward(x, w, b)
    out = jax.block_until_ready(out)
    out_f32 = out.astype(jnp.float32)

    # Reference at matched precision (bf16 operands, f32 accumulate/softmax).
    ref_logits = jnp.dot(x.astype(jnp.bfloat16), w.astype(jnp.bfloat16),
                         preferred_element_type=jnp.float32) + b
    ref = jax.nn.softmax(ref_logits, axis=1)
    # Full-f32 PyTorch-equivalent reference.
    ref_f32 = jax.nn.softmax(x @ w + b, axis=1)

    assert out.shape == (batch, out_channels), "bad output shape"
    # Tolerances account for bf16 matmul operands + bf16 output storage.
    assert jnp.allclose(out_f32, ref, atol=1e-2, rtol=1e-2), "mismatch vs reference"
    assert jnp.allclose(jnp.sum(out_f32, axis=1), 1.0, atol=5e-3), "rows not normalized"
    assert jnp.allclose(out_f32, ref_f32, atol=2e-2, rtol=2e-2), "far from f32 reference"

    print("KERNEL_OK")
</pallas_src>

<mosaic_0001>
module attributes {stable_mosaic.version = 11 : i64} {
  func.func @_sgc_kernel(%arg0: i32, %arg1: memref<8x32xf32, #tpu.memory_space<vmem>>, %arg2: memref<32x128xbf16, #tpu.memory_space<vmem>>, %arg3: memref<1x128xf32, #tpu.memory_space<vmem>>, %arg4: memref<8x128xbf16, #tpu.memory_space<vmem>>) attributes {dimension_semantics = [#tpu.dimension_semantics<parallel>], iteration_bounds = array<i64: 1>, scalar_prefetch = 0 : i64, scratch_operands = 0 : i64, tpu.core_type = #tpu.core_type<tc>, window_params = [{transform_indices = @transform_0, window_bounds = array<i64: 8, 32>}, {pipeline_mode = #tpu.pipeline_mode<synchronous>, transform_indices = @transform_1, window_bounds = array<i64: 32, 128>}, {pipeline_mode = #tpu.pipeline_mode<synchronous>, transform_indices = @transform_2, window_bounds = array<i64: 1, 128>}, {transform_indices = @transform_3, window_bounds = array<i64: 8, 128>}]} {
    %c0 = arith.constant 0 : index
    %c0_0 = arith.constant 0 : index
    %0 = vector.load %arg1[%c0, %c0_0] : memref<8x32xf32, #tpu.memory_space<vmem>>, vector<8x32xf32>
    %1 = arith.truncf %0 : vector<8x32xf32> to vector<8x32xbf16>
    %c0_1 = arith.constant 0 : index
    %c0_2 = arith.constant 0 : index
    %2 = vector.load %arg2[%c0_1, %c0_2] : memref<32x128xbf16, #tpu.memory_space<vmem>>, vector<32x128xbf16>
    %cst = arith.constant dense<0.000000e+00> : vector<8x128xf32>
    %3 = tpu.matmul %1, %2, %cst {dimension_numbers = #tpu.dot_dimension_numbers<[1], [0], [0], [1], [0, 0, 1, 1], [], []>} : vector<8x32xbf16>, vector<32x128xbf16>, vector<8x128xf32> -> vector<8x128xf32>
    %c0_3 = arith.constant 0 : index
    %c0_4 = arith.constant 0 : index
    %4 = vector.load %arg3[%c0_3, %c0_4] : memref<1x128xf32, #tpu.memory_space<vmem>>, vector<1x128xf32>
    %5 = vector.broadcast %4 : vector<1x128xf32> to vector<8x128xf32>
    %6 = arith.addf %3, %5 : vector<8x128xf32>
    %cst_5 = arith.constant dense<0xFF800000> : vector<8xf32>
    %7 = vector.multi_reduction <maximumf>, %6, %cst_5 [1] : vector<8x128xf32> to vector<8xf32>
    %8 = vector.shape_cast %7 : vector<8xf32> to vector<8x1xf32>
    %9 = vector.broadcast %8 : vector<8x1xf32> to vector<8x128xf32>
    %10 = arith.subf %6, %9 : vector<8x128xf32>
    %11 = math.exp %10 : vector<8x128xf32>
    %cst_6 = arith.constant dense<0.000000e+00> : vector<8xf32>
    %12 = vector.multi_reduction <add>, %11, %cst_6 [1] : vector<8x128xf32> to vector<8xf32>
    %13 = vector.shape_cast %12 : vector<8xf32> to vector<8x1xf32>
    %14 = vector.broadcast %13 : vector<8x1xf32> to vector<8x128xf32>
    %15 = arith.divf %11, %14 : vector<8x128xf32>
    %16 = arith.truncf %15 : vector<8x128xf32> to vector<8x128xbf16>
    %c0_7 = arith.constant 0 : index
    %c0_8 = arith.constant 0 : index
    %17 = vector.load %arg4[%c0_7, %c0_8] : memref<8x128xbf16, #tpu.memory_space<vmem>>, vector<8x128xbf16>
    tpu.vector_store %arg4[%c0_7, %c0_8], %16 {strides = array<i32>} : memref<8x128xbf16, #tpu.memory_space<vmem>>, vector<8x128xbf16>,
    return
  }
  func.func @transform_0(%arg0: i32) -> (i32, i32) {
    %c0_i32 = arith.constant 0 : i32
    %c0_i32_0 = arith.constant 0 : i32
    return %arg0, %c0_i32 : i32, i32
  }
  func.func @transform_1(%arg0: i32) -> (i32, i32) {
    %c0_i32 = arith.constant 0 : i32
    %c0_i32_0 = arith.constant 0 : i32
    %c0_i32_1 = arith.constant 0 : i32
    return %c0_i32, %c0_i32_0 : i32, i32
  }
  func.func @transform_2(%arg0: i32) -> (i32, i32) {
    %c0_i32 = arith.constant 0 : i32
    %c0_i32_0 = arith.constant 0 : i32
    %c0_i32_1 = arith.constant 0 : i32
    return %c0_i32, %c0_i32_0 : i32, i32
  }
  func.func @transform_3(%arg0: i32) -> (i32, i32) {
    %c0_i32 = arith.constant 0 : i32
    %c0_i32_0 = arith.constant 0 : i32
    return %arg0, %c0_i32 : i32, i32
  }
}

</mosaic_0001>

<bundles_post_ra>
// kernel: sgc_forward.1
= control target key start
LH: loop header
LB: loop body
LE: loop exit
PB: predicated region body
PF: predicated region fallthrough
CT: control target
= control target key end

     0   :  { %s174_s0 = inlined_call_operand.vmem [shape: f32[8,32], index: 0, kind: input, shape index: {}]   ;;  %s175_s1 = inlined_call_operand.vmem [shape: bf16[32,128], index: 1, kind: input, shape index: {}]   ;;  %s176_s2 = inlined_call_operand.vmem [shape: f32[1,128], index: 2, kind: input, shape index: {}]   ;;  %s177_s3 = inlined_call_operand.hbm [shape: bf16[8,128], index: 3, kind: output, shape index: {}]  }
   0x1   :  { %v105_v0 = vld [vmem:[%s175_s1 + $0x8] sm:$0xff] }
   0x2   :  { %8 = vsyncpa [#allocation3], 0  ;;  %48 = vmatpush.bf16.msra.mxu0 %v105_v0  ;;  %v104_v1 = vld [vmem:[%s175_s1] sm:$0xff]  ;;  %vm38_vm0 = vcmask 261120   ;;  %s86_s21 = sshll.u32 %s177_s3, 4  ;;  %s87_s21 = int_to_ptr.hbm [resolvable:$true] %s86_s21 }
   0x3   :  { %v16_v2 = vld [vmem:[%s174_s0] sm:$0xff]  ;;  %s138_s0 = smov [#allocation2]  }
   0x4   :  { %v17_v3 = vpack.c.bf16 %v16_v2, %v16_v2  ;;  %v107_v4 = vld [vmem:[%s176_s2] ss:$0 sm:$0xff]  ;;  %s84_s1 = sshll.u32 %s138_s0, 4  ;;  %s85_s1 = int_to_ptr.vmem [resolvable:$true] %s84_s1 }
   0x6   :  { %49 = vmatpush.bf16.msra.mxu0 %v104_v1 }
   0x9   :  { %103 = vmatmul.msk.bf16.vlgmr.msra.gmra.mxu0 %vm38_vm0, %v17_v3 }
  0x86   :  { %v51_v5 = vpop.f32.mrf.mxu0 }
  0x87   :  { %v52_v6 = vadd.f32 %v107_v4, %v51_v5 }
  0x89   :  { %55 = vmax.xlane.f32.xlu0 %v52_v6 }
  0x8e   :  { %v53_v7 = vpop.f32.mrf.mxu0 }
  0xfc   :  { %v56_v8 = vpop.xlane.xlu0 %55 }
  0xfd   :  { %v57_v9 = vsub.f32 %v52_v6, %v56_v8 }
  0xff   :  { %v58_v10 = vmul.f32 1.442695, %v57_v9 }
 0x101   :  { %108 = vpow2.f32 %v58_v10 }
 0x107   :  { %v109_v11 = vpop.eup %108 }
 0x108   :  { %60 = vadd.xlane.f32.xlu0 %v109_v11 }
 0x17b   :  { %v61_v12 = vpop.xlane.xlu0 %60 }
 0x17c   :  { %110 = vrcp.f32 %v61_v12  ;;  %v73_v16 = vand.u32 2147483648, %v61_v12  ;;  %v71_v18 = vand.u32 2147483647, %v61_v12  ;;  %vm67_vm2 = vweird.f32 %v61_v12 }
 0x17e   :  { %v74_v20 = vor.u32 1.1754944e-38, %v73_v16  ;;  %vm72_vm4 = vcmp.eq.f32.partialorder %v71_v18, 8.507059e+37 }
 0x182   :  { %v111_v13 = vpop.eup %110 }
 0x183   :  { %v63_v14 = vmul.f32 %v111_v13, %v61_v12  ;;  %vm68_vm1 = vweird.f32 %v111_v13 }
 0x184   :  { %vm69_vm3 = vmor %vm67_vm2, %vm68_vm1 }
 0x185   :  { %v64_v15 = vsub.f32 1.0, %v63_v14 }
 0x187   :  { %v65_v17 = vmul.f32 %v111_v13, %v64_v15 }
 0x189   :  { %v66_v19 = vadd.f32 %v111_v13, %v65_v17 }
 0x18b   :  { %v70_v21 = vsel %vm69_vm3, %v111_v13, %v66_v19 }
 0x18c   :  { %v75_v22 = vsel %vm72_vm4, %v74_v20, %v70_v21 }
 0x18d   :  { %v76_v23 = vmul.f32 %v109_v11, %v75_v22 }
 0x18f   :  { %v77_v24 = vpack.c.bf16 %v76_v23, %v76_v23 }
 0x191   :  { %78 = vst [vmem:[#allocation2] sm:$0xf] %v77_v24 }
 0x192   :  { %89 = dma.vmem_to_hbm [thread:$0]  %s85_s1, 64, %s87_s21, [#allocation3]  }
 0x193   :  { %136 = dma.done.wait [#allocation3], 64  }
 0x194   :  { %137 = vsyncadd [#allocation3], 4294967232 }
 0x195   :  { %94 = vsyncpa [#allocation3], 1 }

</bundles_post_ra>
